<compile_context>
chip_gen: v7x
topology: tpu7x:2x2x1
jax: 0.10.0
libtpu: 0.0.40
codegen_flags: <defaults>
</compile_context>

<pallas_src>
import jax
import jax.numpy as jnp
from jax import lax
from jax.experimental import pallas as pl
from jax.experimental.pallas import tpu as pltpu


def _uniform_from_index(seed_u32, shape, block_rows, lane):
    """Stateless U[0,1) per element, keyed on global element index + seed."""
    r = lax.broadcasted_iota(jnp.int32, shape, 0)
    c = lax.broadcasted_iota(jnp.int32, shape, 1)
    gidx = ((pl.program_id(0) * block_rows + r) * lane + c).astype(jnp.uint32)
    # lowbias32-style integer mixer
    h = gidx + seed_u32 * jnp.uint32(0x9E3779B9)
    h = h ^ (h >> 16)
    h = h * jnp.uint32(0x7FEB352D)
    h = h ^ (h >> 15)
    h = h * jnp.uint32(0x846CA68B)
    h = h ^ (h >> 16)
    # uniform in [0, 1) from the top 24 bits
    return (h >> 8).astype(jnp.float32) * jnp.float32(1.0 / (1 << 24))


def _sign_train_kernel(seed_ref, x_ref, o_ref):
    block_rows, lane = x_ref.shape
    seed_u32 = seed_ref[0].astype(jnp.uint32)
    prob = _uniform_from_index(seed_u32, x_ref.shape, block_rows, lane)
    x = x_ref[...].astype(jnp.float32)
    out = jnp.where((1.0 - x) * 0.5 <= prob, 1.0, -1.0)
    o_ref[...] = out.astype(o_ref.dtype)


def _sign_eval_kernel(x_ref, o_ref):
    o_ref[...] = jnp.sign(x_ref[...]).astype(o_ref.dtype)


def sign_forward(x, *, training=True, seed=0):
    """Forward pass of the Sign module. Accepts any shape (e.g. NCHW)."""
    orig_shape = x.shape
    dtype = x.dtype

    flat = x.reshape(-1)
    n = flat.shape[0]

    # Pick the widest lane-dense last dim that divides n (with rows % 8 == 0),
    # to avoid wrapper-side pad/slice copies whenever possible.
    lane = 128
    for cand in (1024, 512, 256, 128):
        if n % (8 * cand) == 0:
            lane = cand
            break

    tile_elems = 8 * lane
    padded_n = pl.cdiv(n, tile_elems) * tile_elems
    needs_pad = padded_n != n
    if needs_pad:
        flat = jnp.pad(flat, (0, padded_n - n))
    x2d = flat.reshape(-1, lane)
    rows = x2d.shape[0]  # always a multiple of 8

    # ~2 MiB f32 per block; input + output double buffers stay well under the
    # 32 MiB scoped-VMEM default on v5e/v6e/v7x.
    block_elems = 512 * 1024
    block_rows = max(8, min(rows, (block_elems // lane) // 8 * 8))
    grid = (pl.cdiv(rows, block_rows),)

    compiler_params = pltpu.CompilerParams(dimension_semantics=("parallel",))
    data_spec = pl.BlockSpec((block_rows, lane), lambda i: (i, 0))

    if training:
        seed_arr = jnp.asarray([seed], dtype=jnp.int32)
        out2d = pl.pallas_call(
            _sign_train_kernel,
            out_shape=jax.ShapeDtypeStruct((rows, lane), dtype),
            grid=grid,
            in_specs=[
                pl.BlockSpec(memory_space=pltpu.SMEM),  # seed scalar
                data_spec,
            ],
            out_specs=data_spec,
            compiler_params=compiler_params,
        )(seed_arr, x2d)
    else:
        out2d = pl.pallas_call(
            _sign_eval_kernel,
            out_shape=jax.ShapeDtypeStruct((rows, lane), dtype),
            grid=grid,
            in_specs=[data_spec],
            out_specs=data_spec,
            compiler_params=compiler_params,
        )(x2d)

    flat_out = out2d.reshape(-1)
    if needs_pad:
        flat_out = flat_out[:n]
    return flat_out.reshape(orig_shape)


if __name__ == "__main__":
    key = jax.random.PRNGKey(0)
    # Small NCHW input consistent with an image-compression bottleneck tensor.
    x = jax.random.uniform(key, (2, 4, 16, 16), dtype=jnp.float32,
                           minval=-1.0, maxval=1.0)

    # Training-mode (stochastic) forward.
    y_train = sign_forward(x, training=True, seed=1234)
    y_train = jax.block_until_ready(y_train)
    assert y_train.shape == x.shape and y_train.dtype == x.dtype
    # All outputs must be exactly +1 or -1, and both values should occur.
    assert bool(jnp.all(jnp.abs(y_train) == 1.0))
    frac_pos = jnp.mean((y_train > 0).astype(jnp.float32))
    assert 0.2 < float(frac_pos) < 0.8  # loose i.i.d. sanity check

    # Eval-mode (deterministic sign) forward.
    y_eval = sign_forward(x, training=False)
    y_eval = jax.block_until_ready(y_eval)
    assert bool(jnp.all(y_eval == jnp.sign(x)))

    print("KERNEL_OK")
</pallas_src>

<mosaic_0001>
module attributes {stable_mosaic.version = 11 : i64} {
  func.func @_sign_train_kernel(%arg0: i32, %arg1: memref<1xi32, #tpu.memory_space<smem>>, %arg2: memref<8x256xf32, #tpu.memory_space<vmem>>, %arg3: memref<8x256xf32, #tpu.memory_space<vmem>>) attributes {dimension_semantics = [#tpu.dimension_semantics<parallel>], iteration_bounds = array<i64: 1>, scalar_prefetch = 0 : i64, scratch_operands = 0 : i64, tpu.core_type = #tpu.core_type<tc>, window_params = [{transform_indices = @transform_0, window_bounds = array<i64: 1>}, {transform_indices = @transform_1, window_bounds = array<i64: 8, 256>}, {transform_indices = @transform_2, window_bounds = array<i64: 8, 256>}]} {
    %c0 = arith.constant 0 : index
    %0 = memref.load %arg1[%c0] : memref<1xi32, #tpu.memory_space<smem>>
    %1 = tpu.iota {dimensions = array<i32: 0>} : vector<8x256xi32>
    %2 = tpu.iota {dimensions = array<i32: 1>} : vector<8x256xi32>
    %c8_i32 = arith.constant 8 : i32
    %3 = arith.muli %arg0, %c8_i32 : i32
    %4 = vector.broadcast %3 : i32 to vector<8x256xi32>
    %5 = arith.addi %4, %1 : vector<8x256xi32>
    %c256_i32 = arith.constant 256 : i32
    %6 = vector.broadcast %c256_i32 : i32 to vector<8x256xi32>
    %7 = arith.muli %5, %6 : vector<8x256xi32>
    %8 = arith.addi %7, %2 : vector<8x256xi32>
    %c-1640531527_i32 = arith.constant -1640531527 : i32
    %9 = arith.muli %0, %c-1640531527_i32 : i32
    %10 = vector.broadcast %9 : i32 to vector<8x256xi32>
    %11 = arith.addi %8, %10 : vector<8x256xi32>
    %c16_i32 = arith.constant 16 : i32
    %12 = vector.broadcast %c16_i32 : i32 to vector<8x256xi32>
    %13 = arith.shrui %11, %12 : vector<8x256xi32>
    %14 = arith.xori %11, %13 : vector<8x256xi32>
    %c2146121005_i32 = arith.constant 2146121005 : i32
    %15 = vector.broadcast %c2146121005_i32 : i32 to vector<8x256xi32>
    %16 = arith.muli %14, %15 : vector<8x256xi32>
    %c15_i32 = arith.constant 15 : i32
    %17 = vector.broadcast %c15_i32 : i32 to vector<8x256xi32>
    %18 = arith.shrui %16, %17 : vector<8x256xi32>
    %19 = arith.xori %16, %18 : vector<8x256xi32>
    %c-2073254261_i32 = arith.constant -2073254261 : i32
    %20 = vector.broadcast %c-2073254261_i32 : i32 to vector<8x256xi32>
    %21 = arith.muli %19, %20 : vector<8x256xi32>
    %c16_i32_0 = arith.constant 16 : i32
    %22 = vector.broadcast %c16_i32_0 : i32 to vector<8x256xi32>
    %23 = arith.shrui %21, %22 : vector<8x256xi32>
    %24 = arith.xori %21, %23 : vector<8x256xi32>
    %c8_i32_1 = arith.constant 8 : i32
    %25 = vector.broadcast %c8_i32_1 : i32 to vector<8x256xi32>
    %26 = arith.shrui %24, %25 : vector<8x256xi32>
    %27 = arith.uitofp %26 : vector<8x256xi32> to vector<8x256xf32>
    %cst = arith.constant 5.96046448E-8 : f32
    %28 = vector.broadcast %cst : f32 to vector<8x256xf32>
    %29 = arith.mulf %27, %28 : vector<8x256xf32>
    %c0_2 = arith.constant 0 : index
    %c0_3 = arith.constant 0 : index
    %30 = vector.load %arg2[%c0_2, %c0_3] : memref<8x256xf32, #tpu.memory_space<vmem>>, vector<8x256xf32>
    %cst_4 = arith.constant 1.000000e+00 : f32
    %31 = vector.broadcast %cst_4 : f32 to vector<8x256xf32>
    %32 = arith.subf %31, %30 : vector<8x256xf32>
    %cst_5 = arith.constant 5.000000e-01 : f32
    %33 = vector.broadcast %cst_5 : f32 to vector<8x256xf32>
    %34 = arith.mulf %32, %33 : vector<8x256xf32>
    %35 = arith.cmpf ole, %34, %29 : vector<8x256xf32>
    %cst_6 = arith.constant 1.000000e+00 : f32
    %cst_7 = arith.constant -1.000000e+00 : f32
    %36 = vector.broadcast %cst_6 : f32 to vector<8x256xf32>
    %37 = vector.broadcast %cst_7 : f32 to vector<8x256xf32>
    %38 = arith.select %35, %36, %37 : vector<8x256xi1>, vector<8x256xf32>
    %c0_8 = arith.constant 0 : index
    %c0_9 = arith.constant 0 : index
    %39 = vector.load %arg3[%c0_8, %c0_9] : memref<8x256xf32, #tpu.memory_space<vmem>>, vector<8x256xf32>
    tpu.vector_store %arg3[%c0_8, %c0_9], %38 {strides = array<i32>} : memref<8x256xf32, #tpu.memory_space<vmem>>, vector<8x256xf32>,
    return
  }
  func.func @transform_0(%arg0: i32) -> i32 {
    %c0_i32 = arith.constant 0 : i32
    %c0_i32_0 = arith.constant 0 : i32
    return %c0_i32 : i32
  }
  func.func @transform_1(%arg0: i32) -> (i32, i32) {
    %c0_i32 = arith.constant 0 : i32
    %c0_i32_0 = arith.constant 0 : i32
    return %arg0, %c0_i32 : i32, i32
  }
  func.func @transform_2(%arg0: i32) -> (i32, i32) {
    %c0_i32 = arith.constant 0 : i32
    %c0_i32_0 = arith.constant 0 : i32
    return %arg0, %c0_i32 : i32, i32
  }
}

</mosaic_0001>

<bundles_post_ra>
// kernel: tpu_custom_call.1
= control target key start
LH: loop header
LB: loop body
LE: loop exit
PB: predicated region body
PF: predicated region fallthrough
CT: control target
= control target key end

     0   :  { %8 = vsyncpa [#allocation4], 0  ;;  %s196_s0 = inlined_call_operand.<no memory space> [shape: s32[1], index: 0, kind: input, shape index: {}]   ;;  %s197_s1 = inlined_call_operand.hbm [shape: f32[8,256], index: 1, kind: input, shape index: {}]   ;;  %s198_s2 = inlined_call_operand.hbm [shape: f32[8,256], index: 2, kind: output, shape index: {}]  }
   0x1   :  { %9 = vsyncpa [#allocation5], 0  ;;  %s151_s9 = smov [#allocation3]   ;;  %s103_s13 = scalar_lea.hbm %s197_s1, 256 }
   0x2   :  { %s18_s10 = sshll.u32 %s151_s9, 4  ;;  %p104_p0 = scmp.ne.s32.totalorder %s197_s1, %s103_s13  ;;  %s19_s10 = int_to_ptr.vmem [resolvable:$true] %s18_s10 }
   0x3   :  { %p107_p1 = scmp.lt.u32.totalorder %s103_s13, %s197_s1 }
   0x5   :  { %p109_p2 = pnand %p107_p1, %p104_p0 }
   0x7   :  { %112 = shalt.err (!%p109_p2)
}
   0x8   :  { %s113_s18 = scalar_lea.vmem %s19_s10, 256  ;;  %p118_p4 = scmp.lt.s32.totalorder %s19_s10, %s19_s10 }
   0x9   :  { %p114_p3 = scmp.ne.s32.totalorder %s19_s10, %s113_s18  ;;  %p119_p5 = scmp.lt.s32.totalorder %s113_s18, %s113_s18 }
   0xb   :  { %p120_p6 = por %p119_p5, %p118_p4 }
   0xd   :  { %p121_p7 = pnand %p120_p6, %p114_p3 }
   0xf   :  { %124 = shalt.err (!%p121_p7)
}
  0x10   :  { %21 = dma.hbm_to_vmem [thread:$0]  %s197_s1, 256, %s19_s10, [#allocation4]  }
  0x11   :  { %147 = dma.done.wait [#allocation4], 256  }
  0x12   :  { %148 = vsyncadd [#allocation4], 4294967040  ;;  %v26_v0 = vlaneseq  ;;  %s37_s23 = smul.u32 2654435769, %s196_s0  ;;  %v73_v27 = vld [vmem:[#allocation3] sm:$0xff]  ;;  %v74_v29 = vld [vmem:[#allocation3 + $0x8] sm:$0xff] }
  0x13   :  { %v75_v34 = vsub.f32 1.0, %v73_v27  ;;  %v76_v35 = vsub.f32 1.0, %v74_v29  ;;  %s152_s0 = smov [#allocation6]   ;;  %v153_v48 = vmov -1.0  }
  0x14   :  { %v27_v1 = vshrl.u32 %v26_v0, 7  ;;  %v29_v2 = vand.u32 127, %v26_v0  ;;  %v38_v5 = vstv %s37_s23  ;;  %s91_s1 = sshll.u32 %s152_s0, 4  ;;  %s92_s1 = int_to_ptr.vmem [resolvable:$true] %s91_s1 }
  0x15   :  { %v77_v43 = vmul.f32 0.5, %v75_v34  ;;  %v78_v45 = vmul.f32 0.5, %v76_v35  ;;  %s125_s24 = scalar_lea.vmem %s92_s1, 256  ;;  %p130_p9 = scmp.lt.s32.totalorder %s92_s1, %s92_s1 }
  0x16   :  { %v34_v3 = vmul.u32 256, %v27_v1  ;;  %v30_v4 = vadd.s32 128, %v29_v2  ;;  %p126_p8 = scmp.ne.s32.totalorder %s92_s1, %s125_s24  ;;  %p131_p10 = scmp.lt.s32.totalorder %s125_s24, %s125_s24 }
  0x18   :  { %v35_v6 = vadd.s32 %v34_v3, %v29_v2  ;;  %v36_v7 = vadd.s32 %v34_v3, %v30_v4  ;;  %p132_p11 = por %p131_p10, %p130_p9 }
  0x1a   :  { %v39_v8 = vadd.s32 %v38_v5, %v35_v6  ;;  %v40_v9 = vadd.s32 %v38_v5, %v36_v7  ;;  %p133_p12 = pnand %p132_p11, %p126_p8 }
  0x1c   :  { %v41_v10 = vshrl.u32 %v39_v8, 16  ;;  %v42_v11 = vshrl.u32 %v40_v9, 16 }
  0x1e   :  { %v43_v12 = vxor.u32 %v41_v10, %v39_v8  ;;  %v44_v13 = vxor.u32 %v42_v11, %v40_v9 }
  0x20   :  { %v45_v14 = vmul.u32 2146121005, %v43_v12  ;;  %v46_v15 = vmul.u32 2146121005, %v44_v13 }
  0x22   :  { %v47_v16 = vshrl.u32 %v45_v14, 15  ;;  %v48_v17 = vshrl.u32 %v46_v15, 15 }
  0x24   :  { %v49_v18 = vxor.u32 %v47_v16, %v45_v14  ;;  %v50_v19 = vxor.u32 %v48_v17, %v46_v15 }
  0x26   :  { %v51_v20 = vmul.u32 2221713035, %v49_v18  ;;  %v52_v21 = vmul.u32 2221713035, %v50_v19 }
  0x28   :  { %v53_v22 = vshrl.u32 %v51_v20, 16  ;;  %v54_v23 = vshrl.u32 %v52_v21, 16 }
  0x2a   :  { %v55_v24 = vxor.u32 %v53_v22, %v51_v20  ;;  %v56_v25 = vxor.u32 %v54_v23, %v52_v21 }
  0x2c   :  { %v57_v26 = vshrl.u32 %v55_v24, 8  ;;  %v58_v28 = vshrl.u32 %v56_v25, 8 }
  0x2e   :  { %v59_v30 = vshrl.u32 %v57_v26, 16  ;;  %v60_v31 = vand.u32 65535, %v57_v26  ;;  %v65_v32 = vshrl.u32 %v58_v28, 16  ;;  %v66_v33 = vand.u32 65535, %v58_v28 }
  0x30   :  { %v61_v36 = vcvt.s32.f32 %v59_v30  ;;  %v63_v37 = vcvt.s32.f32 %v60_v31  ;;  %v67_v38 = vcvt.s32.f32 %v65_v32  ;;  %v69_v39 = vcvt.s32.f32 %v66_v33 }
  0x32   :  { %v62_v40 = vmul.f32 65536.0, %v61_v36  ;;  %v68_v41 = vmul.f32 65536.0, %v67_v38 }
  0x34   :  { %v64_v42 = vadd.f32 %v63_v37, %v62_v40  ;;  %v70_v44 = vadd.f32 %v69_v39, %v68_v41 }
  0x36   :  { %v71_v46 = vmul.f32 5.9604645e-08, %v64_v42  ;;  %v72_v47 = vmul.f32 5.9604645e-08, %v70_v44 }
  0x38   :  { %vm79_vm0 = vcmp.le.f32.partialorder %v77_v43, %v71_v46  ;;  %vm80_vm1 = vcmp.le.f32.partialorder %v78_v45, %v72_v47 }
  0x39   :  { %v81_v49 = vsel %vm79_vm0, 1.0, %v153_v48  ;;  %v82_v50 = vsel %vm80_vm1, 1.0, %v153_v48 }
  0x3a   :  { %83 = vst [vmem:[#allocation6] sm:$0xff] %v81_v49  ;;  %84 = vst [vmem:[#allocation6 + $0x8] sm:$0xff] %v82_v50 }
  0x3b   :  { %136 = shalt.err (!%p133_p12)
}
  0x3c   :  { %s137_s27 = scalar_lea.hbm %s198_s2, 256 }
  0x3d   :  { %p138_p13 = scmp.ne.s32.totalorder %s198_s2, %s137_s27  ;;  %p141_p0 = scmp.lt.u32.totalorder %s137_s27, %s198_s2 }
  0x3f   :  { %p143_p1 = pnand %p141_p0, %p138_p13 }
  0x41   :  { %146 = shalt.err (!%p143_p1)
}
  0x42   :  { %94 = dma.vmem_to_hbm [thread:$0]  %s92_s1, 256, %s198_s2, [#allocation5]  }
  0x43   :  { %149 = dma.done.wait [#allocation5], 256  }
  0x44   :  { %150 = vsyncadd [#allocation5], 4294967040 }
  0x45   :  { %98 = vsyncpa [#allocation4], 1 }
  0x46   :  { %99 = vsyncpa [#allocation5], 1 }

</bundles_post_ra>
